<compile_context>
chip_gen: v5e
topology: v5e:2x2
jax: 0.10.0
libtpu: 0.0.40
codegen_flags: <defaults>
</compile_context>

<pallas_src>
import jax
import jax.numpy as jnp
from jax.experimental import pallas as pl
from jax.experimental.pallas import tpu as pltpu

EPS = 1e-8


def _make_kernel(in_chan, hid_chan, T, K, dil, pad):
    inv_n = 1.0 / float(hid_chan * T)

    def kernel(x_ref, w1_ref, b1_ref, a1_ref, g1_ref, be1_ref,
               wd_ref, bd_ref, a2_ref, g2_ref, be2_ref,
               wr_ref, br_ref, o_ref, pad_scr):
        # ---- 1x1 conv (in_chan -> hid_chan), bf16 MXU, f32 accumulation ----
        y = jnp.dot(w1_ref[...].astype(jnp.bfloat16),
                    x_ref[0].astype(jnp.bfloat16),
                    preferred_element_type=jnp.float32) + b1_ref[...]     # (H, T)

        # ---- PReLU #1 (scalar alpha read from SMEM) ----
        y = jnp.where(y > 0, y, a1_ref[0, 0] * y)

        # ---- GlobLN #1: fused single-pass statistics ----
        s1 = jnp.sum(y)
        s2 = jnp.sum(y * y)
        mean = s1 * inv_n
        var = jnp.maximum(s2 * inv_n - mean * mean, 0.0)
        y = (y - mean) * jax.lax.rsqrt(var + EPS)
        y = g1_ref[...] * y + be1_ref[...]

        # ---- depthwise conv (groups = hid_chan) via padded scratch ----
        # Zero only the halo columns; the interior is fully overwritten below.
        if pad > 0:
            pad_scr[:, :pad] = jnp.zeros((hid_chan, pad), jnp.float32)
            pad_scr[:, pad + T:] = jnp.zeros((hid_chan, pad), jnp.float32)
        pad_scr[:, pad:pad + T] = y
        acc = wd_ref[:, 0:1] * pad_scr[:, 0:T]
        for k in range(1, K):                                             # static unroll
            acc = acc + wd_ref[:, k:k + 1] * pad_scr[:, k * dil:k * dil + T]
        y = acc + bd_ref[...]

        # ---- PReLU #2 ----
        y = jnp.where(y > 0, y, a2_ref[0, 0] * y)

        # ---- GlobLN #2 ----
        s1 = jnp.sum(y)
        s2 = jnp.sum(y * y)
        mean = s1 * inv_n
        var = jnp.maximum(s2 * inv_n - mean * mean, 0.0)
        y = (y - mean) * jax.lax.rsqrt(var + EPS)
        y = g2_ref[...] * y + be2_ref[...]

        # ---- residual 1x1 conv (hid_chan -> in_chan), bf16 MXU, f32 acc ----
        res = jnp.dot(wr_ref[...].astype(jnp.bfloat16),
                      y.astype(jnp.bfloat16),
                      preferred_element_type=jnp.float32) + br_ref[...]
        o_ref[0] = res.astype(o_ref.dtype)

    return kernel


def conv1d_block(x, params, *, kernel_size, dilation, padding):
    """x: [B, in_chan, T] float32 -> [B, in_chan, T] float32."""
    (w1, b1, a1, g1, be1, wd, bd, a2, g2, be2, wr, br) = params
    B, Cin, T = x.shape
    H = w1.shape[0]

    kernel = _make_kernel(Cin, H, T, kernel_size, dilation, padding)

    # PReLU alphas as SMEM scalars.
    a1s = jnp.reshape(a1, (1, 1)).astype(jnp.float32)
    a2s = jnp.reshape(a2, (1, 1)).astype(jnp.float32)

    full = lambda arr: pl.BlockSpec(arr.shape, lambda b: (0,) * arr.ndim)
    smem = pl.BlockSpec(memory_space=pltpu.MemorySpace.SMEM)

    return pl.pallas_call(
        kernel,
        out_shape=jax.ShapeDtypeStruct((B, Cin, T), x.dtype),
        grid_spec=pltpu.PrefetchScalarGridSpec(
            num_scalar_prefetch=0,
            grid=(B,),
            in_specs=[
                pl.BlockSpec((1, Cin, T), lambda b: (b, 0, 0)),   # x: one batch / step
                full(w1), full(b1), smem, full(g1), full(be1),
                full(wd), full(bd), smem, full(g2), full(be2),
                full(wr), full(br),
            ],
            out_specs=pl.BlockSpec((1, Cin, T), lambda b: (b, 0, 0)),
            scratch_shapes=[pltpu.VMEM((H, T + 2 * padding), jnp.float32)],
        ),
        compiler_params=pltpu.CompilerParams(
            dimension_semantics=("parallel",)),      # batch steps split across cores
    )(x, w1, b1, a1s, g1, be1, wd, bd, a2s, g2, be2, wr, br)


def reference(x, params, *, kernel_size, dilation, padding,
              matmul_dtype=jnp.float32):
    """Pure-JAX reference mirroring the PyTorch module.

    `matmul_dtype=jnp.bfloat16` reproduces the kernel's MXU precision policy
    (bf16 operands, f32 accumulation) for a tight comparison; float32 gives the
    exact PyTorch-fidelity reference.
    """
    (w1, b1, a1, g1, be1, wd, bd, a2, g2, be2, wr, br) = params
    B, Cin, T = x.shape

    def pw_conv(w, v):
        return jnp.einsum('hc,bct->bht', w.astype(matmul_dtype), v.astype(matmul_dtype),
                          preferred_element_type=jnp.float32)

    def globln(y, gamma, beta):
        mean = jnp.mean(y, axis=(1, 2), keepdims=True)
        var = jnp.mean((y - mean) ** 2, axis=(1, 2), keepdims=True)
        yn = (y - mean) / jnp.sqrt(var + EPS)
        return gamma.reshape(1, -1, 1) * yn + beta.reshape(1, -1, 1)

    def prelu(y, a):
        return jnp.where(y > 0, y, a.reshape(()) * y)

    y = pw_conv(w1, x) + b1.reshape(1, -1, 1)
    y = prelu(y, a1)
    y = globln(y, g1, be1)
    ypad = jnp.pad(y, ((0, 0), (0, 0), (padding, padding)))
    acc = jnp.zeros_like(y)
    for k in range(kernel_size):
        acc = acc + wd[:, k].reshape(1, -1, 1) * ypad[:, :, k * dilation:k * dilation + T]
    y = acc + bd.reshape(1, -1, 1)
    y = prelu(y, a2)
    y = globln(y, g2, be2)
    return pw_conv(wr, y) + br.reshape(1, -1, 1)


if __name__ == "__main__":
    # Small, lane-dense demo shapes (T = 128 so output stores are unmasked).
    B, in_chan, hid_chan, T = 2, 4, 32, 128
    kernel_size, dilation, padding = 3, 2, 2   # output length == T

    key = jax.random.PRNGKey(0)
    ks = jax.random.split(key, 10)

    x = jax.random.normal(ks[0], (B, in_chan, T), jnp.float32)

    # Deterministic synthetic parameters (shapes per nn.Module __init__).
    w1 = 0.3 * jax.random.normal(ks[1], (hid_chan, in_chan), jnp.float32)      # Conv1d 1x1
    b1 = 0.1 * jax.random.normal(ks[2], (hid_chan, 1), jnp.float32)
    a1 = jnp.full((1,), 0.25, jnp.float32)                                     # PReLU weight
    g1 = 1.0 + 0.1 * jax.random.normal(ks[7], (hid_chan, 1), jnp.float32)      # GlobLN gamma
    be1 = 0.1 * jax.random.normal(ks[8], (hid_chan, 1), jnp.float32)           # GlobLN beta
    wd = 0.3 * jax.random.normal(ks[3], (hid_chan, kernel_size), jnp.float32)  # depthwise
    bd = 0.1 * jax.random.normal(ks[4], (hid_chan, 1), jnp.float32)
    a2 = jnp.full((1,), 0.25, jnp.float32)
    g2 = 1.0 + 0.1 * jax.random.normal(ks[9], (hid_chan, 1), jnp.float32)
    be2 = 0.1 * jax.random.normal(ks[5], (hid_chan, 1), jnp.float32)
    wr = 0.3 * jax.random.normal(ks[6], (in_chan, hid_chan), jnp.float32)      # res 1x1 conv
    br = 0.1 * jax.random.normal(ks[5], (in_chan, 1), jnp.float32)

    params = (w1, b1, a1, g1, be1, wd, bd, a2, g2, be2, wr, br)

    out = conv1d_block(x, params, kernel_size=kernel_size,
                       dilation=dilation, padding=padding)
    out = jax.block_until_ready(out)
    assert out.shape == (B, in_chan, T)

    # Tight check against a reference that matches the kernel's MXU precision
    # (bf16 operands, f32 accumulation), and a gross sanity check against the
    # pure-f32 PyTorch-fidelity reference.
    ref_matched = reference(x, params, kernel_size=kernel_size, dilation=dilation,
                            padding=padding, matmul_dtype=jnp.bfloat16)
    ref_f32 = reference(x, params, kernel_size=kernel_size, dilation=dilation,
                        padding=padding, matmul_dtype=jnp.float32)

    err = jnp.max(jnp.abs(out - ref_matched))
    assert jnp.allclose(out, ref_matched, atol=1e-3, rtol=1e-3), \
        f"max err vs precision-matched ref {err}"
    assert jnp.allclose(out, ref_f32, atol=5e-1, rtol=5e-1), \
        "gross mismatch vs f32 reference"

    print("KERNEL_OK")
</pallas_src>

<mosaic_0001>
module attributes {stable_mosaic.version = 11 : i64} {
  func.func @kernel(%arg0: i32, %arg1: memref<1x4x128xf32, #tpu.memory_space<vmem>>, %arg2: memref<32x4xf32, #tpu.memory_space<vmem>>, %arg3: memref<32x1xf32, #tpu.memory_space<vmem>>, %arg4: memref<1x1xf32, #tpu.memory_space<smem>>, %arg5: memref<32x1xf32, #tpu.memory_space<vmem>>, %arg6: memref<32x1xf32, #tpu.memory_space<vmem>>, %arg7: memref<32x3xf32, #tpu.memory_space<vmem>>, %arg8: memref<32x1xf32, #tpu.memory_space<vmem>>, %arg9: memref<1x1xf32, #tpu.memory_space<smem>>, %arg10: memref<32x1xf32, #tpu.memory_space<vmem>>, %arg11: memref<32x1xf32, #tpu.memory_space<vmem>>, %arg12: memref<4x32xf32, #tpu.memory_space<vmem>>, %arg13: memref<4x1xf32, #tpu.memory_space<vmem>>, %arg14: memref<1x4x128xf32, #tpu.memory_space<vmem>>, %arg15: memref<32x132xf32, #tpu.memory_space<vmem>>) attributes {dimension_semantics = [#tpu.dimension_semantics<parallel>], iteration_bounds = array<i64: 2>, scalar_prefetch = 0 : i64, scratch_operands = 1 : i64, tpu.core_type = #tpu.core_type<tc>, window_params = [{transform_indices = @transform_0, window_bounds = array<i64: 1, 4, 128>}, {pipeline_mode = #tpu.pipeline_mode<synchronous>, transform_indices = @transform_1, window_bounds = array<i64: 32, 4>}, {pipeline_mode = #tpu.pipeline_mode<synchronous>, transform_indices = @transform_2, window_bounds = array<i64: 32, 1>}, {transform_indices = @transform_3, window_bounds = array<i64: 1, 1>}, {pipeline_mode = #tpu.pipeline_mode<synchronous>, transform_indices = @transform_4, window_bounds = array<i64: 32, 1>}, {pipeline_mode = #tpu.pipeline_mode<synchronous>, transform_indices = @transform_5, window_bounds = array<i64: 32, 1>}, {pipeline_mode = #tpu.pipeline_mode<synchronous>, transform_indices = @transform_6, window_bounds = array<i64: 32, 3>}, {pipeline_mode = #tpu.pipeline_mode<synchronous>, transform_indices = @transform_7, window_bounds = array<i64: 32, 1>}, {transform_indices = @transform_8, window_bounds = array<i64: 1, 1>}, {pipeline_mode = #tpu.pipeline_mode<synchronous>, transform_indices = @transform_9, window_bounds = array<i64: 32, 1>}, {pipeline_mode = #tpu.pipeline_mode<synchronous>, transform_indices = @transform_10, window_bounds = array<i64: 32, 1>}, {pipeline_mode = #tpu.pipeline_mode<synchronous>, transform_indices = @transform_11, window_bounds = array<i64: 4, 32>}, {pipeline_mode = #tpu.pipeline_mode<synchronous>, transform_indices = @transform_12, window_bounds = array<i64: 4, 1>}, {transform_indices = @transform_13, window_bounds = array<i64: 1, 4, 128>}]} {
    %c0 = arith.constant 0 : index
    %c0_0 = arith.constant 0 : index
    %0 = vector.load %arg2[%c0, %c0_0] : memref<32x4xf32, #tpu.memory_space<vmem>>, vector<32x4xf32>
    %1 = arith.truncf %0 : vector<32x4xf32> to vector<32x4xbf16>
    %c0_1 = arith.constant 0 : index
    %c0_2 = arith.constant 0 : index
    %c0_3 = arith.constant 0 : index
    %2 = vector.load %arg1[%c0_1, %c0_2, %c0_3] : memref<1x4x128xf32, #tpu.memory_space<vmem>>, vector<1x4x128xf32>
    %3 = vector.shape_cast %2 : vector<1x4x128xf32> to vector<4x128xf32>
    %4 = arith.truncf %3 : vector<4x128xf32> to vector<4x128xbf16>
    %cst = arith.constant dense<0.000000e+00> : vector<32x128xf32>
    %5 = tpu.matmul %1, %4, %cst {dimension_numbers = #tpu.dot_dimension_numbers<[1], [0], [0], [1], [0, 0, 1, 1], [], []>} : vector<32x4xbf16>, vector<4x128xbf16>, vector<32x128xf32> -> vector<32x128xf32>
    %c0_4 = arith.constant 0 : index
    %c0_5 = arith.constant 0 : index
    %6 = vector.load %arg3[%c0_4, %c0_5] : memref<32x1xf32, #tpu.memory_space<vmem>>, vector<32x1xf32>
    %7 = vector.broadcast %6 : vector<32x1xf32> to vector<32x128xf32>
    %8 = arith.addf %5, %7 : vector<32x128xf32>
    %cst_6 = arith.constant 0.000000e+00 : f32
    %9 = vector.broadcast %cst_6 : f32 to vector<32x128xf32>
    %10 = arith.cmpf ogt, %8, %9 : vector<32x128xf32>
    %c0_7 = arith.constant 0 : index
    %c0_8 = arith.constant 0 : index
    %11 = memref.load %arg4[%c0_7, %c0_8] : memref<1x1xf32, #tpu.memory_space<smem>>
    %12 = vector.broadcast %11 : f32 to vector<32x128xf32>
    %13 = arith.mulf %12, %8 : vector<32x128xf32>
    %14 = arith.select %10, %8, %13 : vector<32x128xi1>, vector<32x128xf32>
    %15 = vector.shape_cast %14 : vector<32x128xf32> to vector<1x32x128xf32>
    %cst_9 = arith.constant dense<0.000000e+00> : vector<1xf32>
    %16 = vector.multi_reduction <add>, %15, %cst_9 [1, 2] : vector<1x32x128xf32> to vector<1xf32>
    %17 = vector.shape_cast %16 : vector<1xf32> to vector<1x1x1xf32>
    %18 = vector.extract %17[0, 0, 0] : f32 from vector<1x1x1xf32>
    %19 = arith.mulf %14, %14 : vector<32x128xf32>
    %20 = vector.shape_cast %19 : vector<32x128xf32> to vector<1x32x128xf32>
    %cst_10 = arith.constant dense<0.000000e+00> : vector<1xf32>
    %21 = vector.multi_reduction <add>, %20, %cst_10 [1, 2] : vector<1x32x128xf32> to vector<1xf32>
    %22 = vector.shape_cast %21 : vector<1xf32> to vector<1x1x1xf32>
    %23 = vector.extract %22[0, 0, 0] : f32 from vector<1x1x1xf32>
    %cst_11 = arith.constant 2.44140625E-4 : f32
    %24 = arith.mulf %18, %cst_11 : f32
    %cst_12 = arith.constant 2.44140625E-4 : f32
    %25 = arith.mulf %23, %cst_12 : f32
    %26 = arith.mulf %24, %24 : f32
    %27 = arith.subf %25, %26 : f32
    %cst_13 = arith.constant 0.000000e+00 : f32
    %28 = arith.maximumf %27, %cst_13 : f32
    %29 = vector.broadcast %24 : f32 to vector<32x128xf32>
    %30 = arith.subf %14, %29 : vector<32x128xf32>
    %cst_14 = arith.constant 9.99999993E-9 : f32
    %31 = arith.addf %28, %cst_14 : f32
    %32 = math.rsqrt %31 : f32
    %33 = vector.broadcast %32 : f32 to vector<32x128xf32>
    %34 = arith.mulf %30, %33 : vector<32x128xf32>
    %c0_15 = arith.constant 0 : index
    %c0_16 = arith.constant 0 : index
    %35 = vector.load %arg5[%c0_15, %c0_16] : memref<32x1xf32, #tpu.memory_space<vmem>>, vector<32x1xf32>
    %36 = vector.broadcast %35 : vector<32x1xf32> to vector<32x128xf32>
    %37 = arith.mulf %36, %34 : vector<32x128xf32>
    %c0_17 = arith.constant 0 : index
    %c0_18 = arith.constant 0 : index
    %38 = vector.load %arg6[%c0_17, %c0_18] : memref<32x1xf32, #tpu.memory_space<vmem>>, vector<32x1xf32>
    %39 = vector.broadcast %38 : vector<32x1xf32> to vector<32x128xf32>
    %40 = arith.addf %37, %39 : vector<32x128xf32>
    %cst_19 = arith.constant 0.000000e+00 : f32
    %41 = vector.broadcast %cst_19 : f32 to vector<32x2xf32>
    %c0_20 = arith.constant 0 : index
    %c0_21 = arith.constant 0 : index
    %42 = vector.load %arg15[%c0_20, %c0_21] : memref<32x132xf32, #tpu.memory_space<vmem>>, vector<32x2xf32>
    tpu.vector_store %arg15[%c0_20, %c0_21], %41 {strides = array<i32>} : memref<32x132xf32, #tpu.memory_space<vmem>>, vector<32x2xf32>,
    %cst_22 = arith.constant 0.000000e+00 : f32
    %43 = vector.broadcast %cst_22 : f32 to vector<32x2xf32>
    %c0_23 = arith.constant 0 : index
    %c130 = arith.constant 130 : index
    %44 = vector.load %arg15[%c0_23, %c130] : memref<32x132xf32, #tpu.memory_space<vmem>>, vector<32x2xf32>
    tpu.vector_store %arg15[%c0_23, %c130], %43 {strides = array<i32>} : memref<32x132xf32, #tpu.memory_space<vmem>>, vector<32x2xf32>,
    %c0_24 = arith.constant 0 : index
    %c2 = arith.constant 2 : index
    %45 = vector.load %arg15[%c0_24, %c2] : memref<32x132xf32, #tpu.memory_space<vmem>>, vector<32x128xf32>
    tpu.vector_store %arg15[%c0_24, %c2], %40 {strides = array<i32>} : memref<32x132xf32, #tpu.memory_space<vmem>>, vector<32x128xf32>,
    %c0_25 = arith.constant 0 : index
    %c0_26 = arith.constant 0 : index
    %46 = vector.load %arg7[%c0_25, %c0_26] : memref<32x3xf32, #tpu.memory_space<vmem>>, vector<32x1xf32>
    %c0_27 = arith.constant 0 : index
    %c0_28 = arith.constant 0 : index
    %47 = vector.load %arg15[%c0_27, %c0_28] : memref<32x132xf32, #tpu.memory_space<vmem>>, vector<32x128xf32>
    %48 = vector.broadcast %46 : vector<32x1xf32> to vector<32x128xf32>
    %49 = arith.mulf %48, %47 : vector<32x128xf32>
    %c0_29 = arith.constant 0 : index
    %c1 = arith.constant 1 : index
    %50 = vector.load %arg7[%c0_29, %c1] : memref<32x3xf32, #tpu.memory_space<vmem>>, vector<32x1xf32>
    %c0_30 = arith.constant 0 : index
    %c2_31 = arith.constant 2 : index
    %51 = vector.load %arg15[%c0_30, %c2_31] : memref<32x132xf32, #tpu.memory_space<vmem>>, vector<32x128xf32>
    %52 = vector.broadcast %50 : vector<32x1xf32> to vector<32x128xf32>
    %53 = arith.mulf %52, %51 : vector<32x128xf32>
    %54 = arith.addf %49, %53 : vector<32x128xf32>
    %c0_32 = arith.constant 0 : index
    %c2_33 = arith.constant 2 : index
    %55 = vector.load %arg7[%c0_32, %c2_33] : memref<32x3xf32, #tpu.memory_space<vmem>>, vector<32x1xf32>
    %c0_34 = arith.constant 0 : index
    %c4 = arith.constant 4 : index
    %56 = vector.load %arg15[%c0_34, %c4] : memref<32x132xf32, #tpu.memory_space<vmem>>, vector<32x128xf32>
    %57 = vector.broadcast %55 : vector<32x1xf32> to vector<32x128xf32>
    %58 = arith.mulf %57, %56 : vector<32x128xf32>
    %59 = arith.addf %54, %58 : vector<32x128xf32>
    %c0_35 = arith.constant 0 : index
    %c0_36 = arith.constant 0 : index
    %60 = vector.load %arg8[%c0_35, %c0_36] : memref<32x1xf32, #tpu.memory_space<vmem>>, vector<32x1xf32>
    %61 = vector.broadcast %60 : vector<32x1xf32> to vector<32x128xf32>
    %62 = arith.addf %59, %61 : vector<32x128xf32>
    %cst_37 = arith.constant 0.000000e+00 : f32
    %63 = vector.broadcast %cst_37 : f32 to vector<32x128xf32>
    %64 = arith.cmpf ogt, %62, %63 : vector<32x128xf32>
    %c0_38 = arith.constant 0 : index
    %c0_39 = arith.constant 0 : index
    %65 = memref.load %arg9[%c0_38, %c0_39] : memref<1x1xf32, #tpu.memory_space<smem>>
    %66 = vector.broadcast %65 : f32 to vector<32x128xf32>
    %67 = arith.mulf %66, %62 : vector<32x128xf32>
    %68 = arith.select %64, %62, %67 : vector<32x128xi1>, vector<32x128xf32>
    %69 = vector.shape_cast %68 : vector<32x128xf32> to vector<1x32x128xf32>
    %cst_40 = arith.constant dense<0.000000e+00> : vector<1xf32>
    %70 = vector.multi_reduction <add>, %69, %cst_40 [1, 2] : vector<1x32x128xf32> to vector<1xf32>
    %71 = vector.shape_cast %70 : vector<1xf32> to vector<1x1x1xf32>
    %72 = vector.extract %71[0, 0, 0] : f32 from vector<1x1x1xf32>
    %73 = arith.mulf %68, %68 : vector<32x128xf32>
    %74 = vector.shape_cast %73 : vector<32x128xf32> to vector<1x32x128xf32>
    %cst_41 = arith.constant dense<0.000000e+00> : vector<1xf32>
    %75 = vector.multi_reduction <add>, %74, %cst_41 [1, 2] : vector<1x32x128xf32> to vector<1xf32>
    %76 = vector.shape_cast %75 : vector<1xf32> to vector<1x1x1xf32>
    %77 = vector.extract %76[0, 0, 0] : f32 from vector<1x1x1xf32>
    %cst_42 = arith.constant 2.44140625E-4 : f32
    %78 = arith.mulf %72, %cst_42 : f32
    %cst_43 = arith.constant 2.44140625E-4 : f32
    %79 = arith.mulf %77, %cst_43 : f32
    %80 = arith.mulf %78, %78 : f32
    %81 = arith.subf %79, %80 : f32
    %cst_44 = arith.constant 0.000000e+00 : f32
    %82 = arith.maximumf %81, %cst_44 : f32
    %83 = vector.broadcast %78 : f32 to vector<32x128xf32>
    %84 = arith.subf %68, %83 : vector<32x128xf32>
    %cst_45 = arith.constant 9.99999993E-9 : f32
    %85 = arith.addf %82, %cst_45 : f32
    %86 = math.rsqrt %85 : f32
    %87 = vector.broadcast %86 : f32 to vector<32x128xf32>
    %88 = arith.mulf %84, %87 : vector<32x128xf32>
    %c0_46 = arith.constant 0 : index
    %c0_47 = arith.constant 0 : index
    %89 = vector.load %arg10[%c0_46, %c0_47] : memref<32x1xf32, #tpu.memory_space<vmem>>, vector<32x1xf32>
    %90 = vector.broadcast %89 : vector<32x1xf32> to vector<32x128xf32>
    %91 = arith.mulf %90, %88 : vector<32x128xf32>
    %c0_48 = arith.constant 0 : index
    %c0_49 = arith.constant 0 : index
    %92 = vector.load %arg11[%c0_48, %c0_49] : memref<32x1xf32, #tpu.memory_space<vmem>>, vector<32x1xf32>
    %93 = vector.broadcast %92 : vector<32x1xf32> to vector<32x128xf32>
    %94 = arith.addf %91, %93 : vector<32x128xf32>
    %c0_50 = arith.constant 0 : index
    %c0_51 = arith.constant 0 : index
    %95 = vector.load %arg12[%c0_50, %c0_51] : memref<4x32xf32, #tpu.memory_space<vmem>>, vector<4x32xf32>
    %96 = arith.truncf %95 : vector<4x32xf32> to vector<4x32xbf16>
    %97 = arith.truncf %94 : vector<32x128xf32> to vector<32x128xbf16>
    %cst_52 = arith.constant dense<0.000000e+00> : vector<4x128xf32>
    %98 = tpu.matmul %96, %97, %cst_52 {dimension_numbers = #tpu.dot_dimension_numbers<[1], [0], [0], [1], [0, 0, 1, 1], [], []>} : vector<4x32xbf16>, vector<32x128xbf16>, vector<4x128xf32> -> vector<4x128xf32>
    %c0_53 = arith.constant 0 : index
    %c0_54 = arith.constant 0 : index
    %99 = vector.load %arg13[%c0_53, %c0_54] : memref<4x1xf32, #tpu.memory_space<vmem>>, vector<4x1xf32>
    %100 = vector.broadcast %99 : vector<4x1xf32> to vector<4x128xf32>
    %101 = arith.addf %98, %100 : vector<4x128xf32>
    %c0_55 = arith.constant 0 : index
    %c0_56 = arith.constant 0 : index
    %c0_57 = arith.constant 0 : index
    %102 = vector.load %arg14[%c0_55, %c0_56, %c0_57] : memref<1x4x128xf32, #tpu.memory_space<vmem>>, vector<1x4x128xf32>
    %103 = vector.shape_cast %102 : vector<1x4x128xf32> to vector<4x128xf32>
    %104 = vector.shape_cast %101 : vector<4x128xf32> to vector<1x4x128xf32>
    tpu.vector_store %arg14[%c0_55, %c0_56, %c0_57], %104 {strides = array<i32>} : memref<1x4x128xf32, #tpu.memory_space<vmem>>, vector<1x4x128xf32>,
    return
  }
  func.func @transform_0(%arg0: i32) -> (i32, i32, i32) {
    %c0_i32 = arith.constant 0 : i32
    %c0_i32_0 = arith.constant 0 : i32
    %c0_i32_1 = arith.constant 0 : i32
    return %arg0, %c0_i32, %c0_i32_0 : i32, i32, i32
  }
  func.func @transform_1(%arg0: i32) -> (i32, i32) {
    %c0_i32 = arith.constant 0 : i32
    %c0_i32_0 = arith.constant 0 : i32
    %c0_i32_1 = arith.constant 0 : i32
    return %c0_i32, %c0_i32_0 : i32, i32
  }
  func.func @transform_2(%arg0: i32) -> (i32, i32) {
    %c0_i32 = arith.constant 0 : i32
    %c0_i32_0 = arith.constant 0 : i32
    %c0_i32_1 = arith.constant 0 : i32
    return %c0_i32, %c0_i32_0 : i32, i32
  }
  func.func @transform_3(%arg0: i32) -> (i32, i32) {
    %c0_i32 = arith.constant 0 : i32
    %c0_i32_0 = arith.constant 0 : i32
    %c0_i32_1 = arith.constant 0 : i32
    return %c0_i32, %c0_i32_0 : i32, i32
  }
  func.func @transform_4(%arg0: i32) -> (i32, i32) {
    %c0_i32 = arith.constant 0 : i32
    %c0_i32_0 = arith.constant 0 : i32
    %c0_i32_1 = arith.constant 0 : i32
    return %c0_i32, %c0_i32_0 : i32, i32
  }
  func.func @transform_5(%arg0: i32) -> (i32, i32) {
    %c0_i32 = arith.constant 0 : i32
    %c0_i32_0 = arith.constant 0 : i32
    %c0_i32_1 = arith.constant 0 : i32
    return %c0_i32, %c0_i32_0 : i32, i32
  }
  func.func @transform_6(%arg0: i32) -> (i32, i32) {
    %c0_i32 = arith.constant 0 : i32
    %c0_i32_0 = arith.constant 0 : i32
    %c0_i32_1 = arith.constant 0 : i32
    return %c0_i32, %c0_i32_0 : i32, i32
  }
  func.func @transform_7(%arg0: i32) -> (i32, i32) {
    %c0_i32 = arith.constant 0 : i32
    %c0_i32_0 = arith.constant 0 : i32
    %c0_i32_1 = arith.constant 0 : i32
    return %c0_i32, %c0_i32_0 : i32, i32
  }
  func.func @transform_8(%arg0: i32) -> (i32, i32) {
    %c0_i32 = arith.constant 0 : i32
    %c0_i32_0 = arith.constant 0 : i32
    %c0_i32_1 = arith.constant 0 : i32
    return %c0_i32, %c0_i32_0 : i32, i32
  }
  func.func @transform_9(%arg0: i32) -> (i32, i32) {
    %c0_i32 = arith.constant 0 : i32
    %c0_i32_0 = arith.constant 0 : i32
    %c0_i32_1 = arith.constant 0 : i32
    return %c0_i32, %c0_i32_0 : i32, i32
  }
  func.func @transform_10(%arg0: i32) -> (i32, i32) {
    %c0_i32 = arith.constant 0 : i32
    %c0_i32_0 = arith.constant 0 : i32
    %c0_i32_1 = arith.constant 0 : i32
    return %c0_i32, %c0_i32_0 : i32, i32
  }
  func.func @transform_11(%arg0: i32) -> (i32, i32) {
    %c0_i32 = arith.constant 0 : i32
    %c0_i32_0 = arith.constant 0 : i32
    %c0_i32_1 = arith.constant 0 : i32
    return %c0_i32, %c0_i32_0 : i32, i32
  }
  func.func @transform_12(%arg0: i32) -> (i32, i32) {
    %c0_i32 = arith.constant 0 : i32
    %c0_i32_0 = arith.constant 0 : i32
    %c0_i32_1 = arith.constant 0 : i32
    return %c0_i32, %c0_i32_0 : i32, i32
  }
  func.func @transform_13(%arg0: i32) -> (i32, i32, i32) {
    %c0_i32 = arith.constant 0 : i32
    %c0_i32_0 = arith.constant 0 : i32
    %c0_i32_1 = arith.constant 0 : i32
    return %arg0, %c0_i32, %c0_i32_0 : i32, i32, i32
  }
}

</mosaic_0001>

<bundles_post_ra>
// kernel: tpu_custom_call.1
= control target key start
LH: loop header
LB: loop body
LE: loop exit
PB: predicated region body
PF: predicated region fallthrough
CT: control target
= control target key end

     0   :  { %s1616_s0 = inlined_call_operand.vmem [shape: f32[2,4,128], index: 0, kind: input, shape index: {}]   ;;  %s1617_s1 = inlined_call_operand.vmem [shape: f32[32,4], index: 1, kind: input, shape index: {}]   ;;  %s1618_s2 = inlined_call_operand.vmem [shape: f32[32,1], index: 2, kind: input, shape index: {}]   ;;  %s1619_s3 = inlined_call_operand.<no memory space> [shape: f32[1,1], index: 3, kind: input, shape index: {}]   ;;  %s1620_s4 = inlined_call_operand.vmem [shape: f32[32,1], index: 4, kind: input, shape index: {}]   ;;  %s1621_s5 = inlined_call_operand.vmem [shape: f32[32,1], index: 5, kind: input, shape index: {}]   ;;  %s1622_s6 = inlined_call_operand.vmem [shape: f32[32,3], index: 6, kind: input, shape index: {}]   ;;  %s1623_s7 = inlined_call_operand.vmem [shape: f32[32,1], index: 7, kind: input, shape index: {}]   ;;  %s1624_s8 = inlined_call_operand.<no memory space> [shape: f32[1,1], index: 8, kind: input, shape index: {}]   ;;  %s1625_s9 = inlined_call_operand.vmem [shape: f32[32,1], index: 9, kind: input, shape index: {}]   ;;  %s1626_s10 = inlined_call_operand.vmem [shape: f32[32,1], index: 10, kind: input, shape index: {}]   ;;  %s1627_s11 = inlined_call_operand.vmem [shape: f32[4,32], index: 11, kind: input, shape index: {}]   ;;  %s1628_s12 = inlined_call_operand.vmem [shape: f32[4,1], index: 12, kind: input, shape index: {}]   ;;  %s1629_s13 = inlined_call_operand.hbm [shape: f32[2,4,128], index: 13, kind: output, shape index: {}]  }
   0x1   :  { %18 = sst [smem:[#allocation3]] %s1619_s3 }
   0x2   :  { %19 = sst [smem:[#allocation4]] %s1624_s8 }
   0x3   :  { %20 = vsyncpa [#allocation6], 0 }
   0x4   :  { %22 = vsyncpa [#allocation6 + $0x1], 0  ;;  %s1319_s29 = smov 0   ;;  %s1321_s30 = smov 0  }
   0x5   :  { %s1323_s14 = smov 0   ;;  %s1325_s15 = smov 0  }
   0x6 LB: > { %1631 = sst [smem:[#allocation8_spill]] %s1229_s14  ;;  %s1340_s3 = sadd.s32 4294967295, %s1233_s15   ;;  %s1233_s15 = sphi %s1325_s15, %s1639_s15   ;;  %s1229_s14 = sphi %s1323_s14, %s1636_s14   ;;  %s1225_s30 = sphi %s1321_s30, %s1638_s30   ;;  %s1221_s29 = sphi %s1319_s29, %s1637_s29  }
   0x7   : > { %s1081_s8 = sadd.s32 4294967294, %s1233_s15   ;;  %s1344_s16 = sadd.s32 1, %s1233_s15  }
   0x8   : > { %s313_s17 = sadd.s32 1, %s1229_s14  ;;  %s310_s18 = ssub.s32 %s1233_s15, %s1344_s16 }
   0x9   : > { %p323_p0 = scmp.ne.s32.totalorder %s1229_s14, %s1225_s30  ;;  %p311_p1 = scmp.eq.s32.totalorder %s310_s18, 0 }
   0xa   : > { %p324_p2 = scmp.eq.s32.totalorder %s1340_s3, 1  ;;  %p329_p3 = scmp.ne.s32.totalorder %s1225_s30, %s1221_s29 }
   0xb   : > { %p330_p4 = scmp.eq.s32.totalorder %s1081_s8, 1  ;;  %p1084_p7 = scmp.ge.s32.totalorder %s1233_s15, 1 }
   0xc   : > { %s1355_s19 = scalar_select %p311_p1, %s1229_s14, %s313_s17  }
   0xd   : > { %p1357_p5 = por %p324_p2, %p323_p0  ;;  %p1361_p6 = por %p330_p4, %p329_p3 }
   0xe   : > { %1632 = sst [smem:[#allocation9_spill]] %s1355_s19  ;;  %p391_p8 = scmp.lt.s32.totalorder %s1233_s15, 3 }
  0x10   : > { %p392_p9 = pnand %p1084_p7, %p391_p8 }
  0x11   : > { %p434_p10 = scmp.lt.s32.totalorder (!%p392_p9), %s1340_s3, 1  ;;  %s505_s18 = sld [smem:[#allocation3]] (!%p392_p9) }
  0x12   : > { %395 = sbr.rel (%p392_p9) target bundleno = 1145 (0x479), region = 72 }
  0x17   : > { %v449_v0 = vld [vmem:[%s1618_s2 + $0x10] sm:$0xff]  ;;  %v447_v1 = vld [vmem:[%s1618_s2] sm:$0xff]  ;;  %v1235_v2 = vmov 0   ;;  %s435_s26 = scalar_select %p434_p10, %s1340_s3, 1  ;;  %v450_v3 = vld [vmem:[%s1618_s2 + $0x18] sm:$0xff]  ;;  %vm478_vm0 = vcmask 1041408   ;;  %v506_v25 = vstv %s505_s18 }
  0x18   : > { %1155 = vset.pattern.permute.xlu1 %v1235_v2  ;;  %1154 = vset.pattern.permute.xlu0 %v1235_v2  ;;  %v448_v4 = vld [vmem:[%s1618_s2 + $0x8] sm:$0xff]  ;;  %v439_v6 = vld [vmem:[%s1617_s1] sm:$0xff]  ;;  %v441_v9 = vld [vmem:[%s1617_s1 + $0x10] sm:$0xff]  ;;  %vm471_vm1 = vcmask 31744   ;;  %vm627_vm9 = vcmask 15360   ;;  %vm632_vm10 = vcmask 31760  }
  0x19   : > { %463 = vperm.xlu1 %1155, %v449_v0   ;;  %453 = vperm.xlu0 %1154, %v447_v1   ;;  %s1086_s27 = sshll.u32 %s435_s26, 2  ;;  %v440_v8 = vld [vmem:[%s1617_s1 + $0x8] sm:$0xff]  ;;  %v442_v10 = vld [vmem:[%s1617_s1 + $0x18] sm:$0xff]  ;;  %v571_v15 = vld [vmem:[%s1620_s4] sm:$0xff]  ;;  %vm653_vm11 = vcmask 1047568   ;;  %vm750_vm12 = vcmask 1031168  }
  0x1a   : > { %1156 = vset.pattern.permute.xlu2 %v1235_v2  ;;  %s437_s22 = scalar_lea.vmem %s1616_s0, %s1086_s27  ;;  %v443_v12 = vpack.c.bf16 %v440_v8, %v439_v6  ;;  %v444_v13 = vpack.c.bf16 %v442_v10, %v441_v9  ;;  %v572_v14 = vld [vmem:[%s1620_s4 + $0x8] sm:$0xff]  ;;  %v599_v17 = vld [vmem:[%s1621_s5] sm:$0xff]  ;;  %v601_v18 = vld [vmem:[%s1621_s5 + $0x10] sm:$0xff]  ;;  %v1236_v6 = vmov 1   ;;  %v1238_v8 = vmov 2  }
  0x1b   : > { %v445_v5 = vld [vmem:[%s437_s22] sm:$0xf]  ;;  %v600_v16 = vld [vmem:[%s1621_s5 + $0x8] sm:$0xff]  ;;  %v574_v19 = vld [vmem:[%s1620_s4 + $0x18] sm:$0xff]  ;;  %vm811_vm13 = vcmask 1014784  }
  0x1c   : > { %v446_v7 = vpack.c.bf16 %v445_v5, %v445_v5  ;;  %v602_v20 = vld [vmem:[%s1621_s5 + $0x18] sm:$0xff]  ;;  %v573_v52 = vld [vmem:[%s1620_s4 + $0x10] sm:$0xff]  ;;  %v662_v5 = vld [vmem:[%s1622_s6] sm:$0xff] }
  0x1d   : > { %v665_v10 = vld [vmem:[%s1622_s6 + $0x18] sm:$0xff] }
  0x1e   : > { %v480_v11 = vsel %vm478_vm0, %v446_v7, 0  ;;  %v663_v7 = vld [vmem:[%s1622_s6 + $0x8] sm:$0xff] }
  0x1f   : > { %489 = vmatpush.bf16.msra.mxu0 %v480_v11  ;;  %1094 = vmatpush.bf16.msra.mxu2 %v480_v11 }
  0x21   : > { %468 = vperm.xlu1 %1155, %v450_v3   ;;  %458 = vperm.xlu0 %1154, %v448_v4   ;;  %v1446_v4 = vld [vmem:[%s1622_s6 + $0x10] sm:$0xff] }
  0x22   : > { %1087 = vmatmul.msk.bf16.vlgmr.msra.gmra.mxu0 %vm471_vm1, %v443_v12  ;;  %1088 = vmatmul.msk.bf16.vlgmr.msra.gmra.mxu2 %vm471_vm1, %v444_v13 }
  0x29   : > { %582 = vperm.xlu1 %1155, %v572_v14   ;;  %577 = vperm.xlu0 %1154, %v571_v15  }
  0x31   : > { %610 = vperm.xlu1 %1155, %v600_v16   ;;  %605 = vperm.xlu0 %1154, %v599_v17  }
  0x39   : > { %615 = vperm.xlu1 %1155, %v601_v18   ;;  %592 = vperm.xlu0 %1154, %v574_v19  }
  0x41   : > { %620 = vperm.xlu0 %1154, %v602_v20   ;;  %1159 = vset.pattern.permute.xlu1 %v1236_v6 }
  0x42   : > { %711 = vperm.xlu1 %1159, %v1446_v4  }
  0x49   : > { %1158 = vset.pattern.permute.xlu0 %v1236_v6 }
  0x4a   : > { %707 = vperm.xlu0 %1158, %v663_v7   ;;  %1161 = vset.pattern.permute.xlu1 %v1238_v8 }
  0x4b   : > { %768 = vperm.xlu1 %1161, %v663_v7  }
  0x52   : > { %1163 = vset.pattern.permute.xlu0 %v1238_v8 }
  0x53   : > { %772 = vperm.xlu0 %1163, %v1446_v4   ;;  %776 = vperm.xlu1 %1161, %v665_v10  }
  0x5b   : > { %1166 = vset.pattern.permute.xlu0 %v1235_v2  ;;  %1165 = vset.pattern.permute.xlu1 %v1235_v2 }
  0x5c   : > { %677 = vperm.xlu1 %1165, %v663_v7  }
  0x8b   : > { %v454_v21 = vpop.permute.xlu0 %453  ;;  %v464_v23 = vpop.permute.xlu1 %463 }
  0x93   : > { %v459_v27 = vpop.permute.xlu0 %458  ;;  %v469_v36 = vpop.permute.xlu1 %468 }
  0x9b   : > { %v578_v18 = vpop.permute.xlu0 %577  ;;  %v583_v19 = vpop.permute.xlu1 %582 }
  0x9f   : > { %v491_v22 = vpop.f32.mrf.mxu0 }
  0xa0   : > { %v492_v24 = vadd.f32 %v491_v22, %v454_v21 }
  0xa2   : > { %v507_v29 = vmul.f32 %v506_v25, %v492_v24  ;;  %vm501_vm2 = vcmp.gt.f32.partialorder %v492_v24, 0.0 }
  0xa3   : > { %v606_v20 = vpop.permute.xlu0 %605  ;;  %v611_v21 = vpop.permute.xlu1 %610 }
  0xa4   : > { %v1420_v33 = vsel %vm501_vm2, %v492_v24, %v507_v29 }
  0xa5   : > { %v496_v26 = vpop.f32.mrf.mxu2  ;;  %v527_v45 = vmul.f32 %v1420_v33, %v1420_v33 }
  0xa6   : > { %v497_v30 = vadd.f32 %v496_v26, %v464_v23 }
  0xa7   : > { %v493_v28 = vpop.f32.mrf.mxu0 }
  0xa8   : > { %v494_v31 = vadd.f32 %v493_v28, %v459_v27  ;;  %v509_v34 = vmul.f32 %v506_v25, %v497_v30  ;;  %vm503_vm4 = vcmp.gt.f32.partialorder %v497_v30, 0.0 }
  0xaa   : > { %vm502_vm3 = vcmp.gt.f32.partialorder %v494_v31, 0.0  ;;  %v508_v32 = vmul.f32 %v506_v25, %v494_v31  ;;  %v1426_v41 = vsel %vm503_vm4, %v497_v30, %v509_v34 }
  0xab   : > { %v529_v48 = vmul.f32 %v1426_v41, %v1426_v41  ;;  %v593_v30 = vpop.permute.xlu0 %592 }
  0xac   : > { %v1422_v35 = vsel %vm502_vm3, %v494_v31, %v508_v32 }
  0xad   : > { %v498_v37 = vpop.f32.mrf.mxu2  ;;  %v515_v38 = vadd.f32 %v1422_v35, %v1420_v33  ;;  %v528_v42 = vmul.f32 %v1422_v35, %v1422_v35 }
  0xae   : > { %v499_v39 = vadd.f32 %v498_v37, %v469_v36  ;;  %v616_v37 = vpop.permute.xlu1 %615 }
  0xaf   : > { %v516_v43 = vadd.f32 %v515_v38, %v1426_v41  ;;  %v531_v47 = vadd.f32 %v528_v42, %v527_v45  ;;  %v1240_v45 = vmov 0.0  }
  0xb0   : > { %v510_v40 = vmul.f32 %v506_v25, %v499_v39  ;;  %vm504_vm5 = vcmp.gt.f32.partialorder %v499_v39, 0.0  ;;  %629 = vst.msk [vmem:[#allocation2 + $0x10] sm:$0xff] %vm627_vm9, %v1240_v45 }
  0xb1   : > { %v532_v50 = vadd.f32 %v531_v47, %v529_v48  ;;  %634 = vst.msk [vmem:[#allocation2 + $0x18] sm:$0xff] %vm632_vm10, %v1240_v45 }
  0xb2   : > { %v1431_v44 = vsel %vm504_vm5, %v499_v39, %v510_v40  ;;  %628 = vst.msk [vmem:[#allocation2] sm:$0xff] %vm627_vm9, %v1240_v45  ;;  %vm988_vm5 = vcmask 261120  }
  0xb3   : > { %v517_v46 = vadd.f32 %v516_v43, %v1431_v44  ;;  %v530_v49 = vmul.f32 %v1431_v44, %v1431_v44  ;;  %v825_v43 = vld [vmem:[%s1623_s7 + $0x8] sm:$0xff]  ;;  %630 = vst.msk [vmem:[#allocation2 + $0x20] sm:$0xff] %vm627_vm9, %v1240_v45 }
  0xb4   : > { %631 = vst.msk [vmem:[#allocation2 + $0x30] sm:$0xff] %vm627_vm9, %v1240_v45 }
  0xb5   : > { %518 = vadd.xlane.f32.xlu2 %v517_v46  ;;  %v533_v51 = vadd.f32 %v532_v50, %v530_v49  ;;  %633 = vst.msk [vmem:[#allocation2 + $0x8] sm:$0xff] %vm632_vm10, %v1240_v45 }
  0xb6   : > { %635 = vst.msk [vmem:[#allocation2 + $0x28] sm:$0xff] %vm632_vm10, %v1240_v45  ;;  %v712_v48 = vpop.permute.xlu1 %711 }
  0xb7   : > { %636 = vst.msk [vmem:[#allocation2 + $0x38] sm:$0xff] %vm632_vm10, %v1240_v45 }
  0xbd   : > { %534 = vadd.xlane.f32.xlu2 %v533_v51 }
  0xbe   : > { %v769_v50 = vpop.permute.xlu1 %768 }
  0xd5   : > { %587 = vperm.xlu2 %1156, %v573_v52   ;;  %v777_v52 = vpop.permute.xlu1 %776 }
  0xdd   : > { %1157 = vset.pattern.permute.xlu2 %v1236_v6 }
  0xde   : > { %703 = vperm.xlu2 %1157, %v662_v5  }
  0xe6   : > { %1160 = vset.pattern.permute.xlu2 %v1238_v8 }
  0xe7   : > { %764 = vperm.xlu2 %1160, %v662_v5  }
  0xef   : > { %1162 = vset.pattern.permute.xlu2 %v1236_v6 }
  0xf0   : > { %715 = vperm.xlu2 %1162, %v665_v10  }
  0xf8   : > { %1164 = vset.pattern.permute.xlu2 %v1235_v2 }
  0xf9   : > { %672 = vperm.xlu2 %1164, %v662_v5  }
 0x128   : > { %v519_v53 = vpop.xlane.xlu2 %518 }
 0x129   : > { %v520_v54 = vrot.slane %v519_v53, 4 }
 0x12b   : > { %v521_v55 = vadd.f32 %v520_v54, %v519_v53 }
 0x12d   : > { %v522_v56 = vrot.slane %v521_v55, 2 }
 0x12f   : > { %v523_v57 = vadd.f32 %v522_v56, %v521_v55  ;;  %v678_v55 = vpop.permute.xlu1 %677 }
 0x130   : > { %v535_v58 = vpop.xlane.xlu2 %534 }
 0x131   : > { %v536_v59 = vrot.slane %v535_v58, 4  ;;  %v524_v60 = vrot.slane %v523_v57, 1 }
 0x133   : > { %v537_v61 = vadd.f32 %v536_v59, %v535_v58  ;;  %v525_v62 = vadd.f32 %v524_v60, %v523_v57 }
 0x135   : > { %v538_v63 = vrot.slane %v537_v61, 2  ;;  %1095 = vpush %v525_v62 }
 0x137   : > { %v539_v0 = vadd.f32 %v538_v63, %v537_v61 }
 0x138   : > { %v588_v2 = vpop.permute.xlu2 %587 }
 0x139   : > { %v540_v1 = vrot.slane %v539_v0, 1 }
 0x13b   : > { %v541_v3 = vadd.f32 %v540_v1, %v539_v0 }
 0x13d   : > { %1097 = vpush %v541_v3 }
 0x140   : > { %v704_v46 = vpop.permute.xlu2 %703 }
 0x148   : > { %v765_v47 = vpop.permute.xlu2 %764 }
 0x150   : > { %v716_v49 = vpop.permute.xlu2 %715 }
 0x158   : > { %v673_v51 = vpop.permute.xlu2 %672 }
 0x166   : > { %s1096_s24 = spop %1095 }
 0x167   : > { %s1451_s27 = smul.f32 0.00024414063, %s1096_s24  ;;  %s1237_s24 = smov 0.0  }
 0x169   : > { %s545_s19 = smul.f32 %s1451_s27, %s1451_s27  ;;  %v548_v22 = vstv %s1451_s27  ;;  %s1239_s27 = smov 2  }
 0x16a   : > { %v549_v23 = vsub.f32 %v1420_v33, %v548_v22  ;;  %v550_v24 = vsub.f32 %v1422_v35, %v548_v22  ;;  %v551_v25 = vsub.f32 %v1426_v41, %v548_v22  ;;  %v552_v31 = vsub.f32 %v1431_v44, %v548_v22  ;;  %v621_v41 = vpop.permute.xlu0 %620  ;;  %v824_v44 = vld [vmem:[%s1623_s7] sm:$0xff] }
 0x16e   : > { %s1098_s18 = spop %1097 }
 0x16f   : > { %s544_s22 = smul.f32 0.00024414063, %s1098_s18  ;;  %s856_s18 = sld [smem:[#allocation4]] }
 0x171   : > { %s546_s23 = ssub.f32 %s544_s22, %s545_s19 }
 0x172   : > { %v708_v54 = vpop.permute.xlu0 %707 }
 0x173   : > { %s547_s25 = smax.f32 %s1237_s24, %s546_s23  ;;  %s1241_s23 = smov 126  }
 0x174   : > { %s553_s26 = sadd.f32 1e-08, %s547_s25  ;;  %s1242_s25 = smov 124  }
 0x176   : > { %v554_v9 = vstv %s553_s26  ;;  %s431_s26 = sand.u32 1, %s1225_s30  }
 0x177   : > { %1167 = vrsqrt.f32 %v554_v9  ;;  %vm561_vm7 = vweird.f32 %v554_v9 }
 0x17a   : > { %v773_v59 = vpop.permute.xlu0 %772 }
 0x17d   : > { %v1168_v11 = vpop.eup %1167 }
 0x17e   : > { %v556_v12 = vmul.f32 %v1168_v11, %v554_v9  ;;  %vm562_vm6 = vweird.f32 %v1168_v11 }
 0x17f   : > { %vm563_vm8 = vmor %vm561_vm7, %vm562_vm6 }
 0x180   : > { %v557_v13 = vmul.f32 %v1168_v11, %v556_v12 }
 0x182   : > { %v558_v14 = vmul.f32 0.5, %v557_v13 }
 0x184   : > { %v559_v15 = vsub.f32 1.5, %v558_v14 }
 0x186   : > { %v560_v16 = vmul.f32 %v1168_v11, %v559_v15 }
 0x188   : > { %v564_v17 = vsel %vm563_vm8, %v1168_v11, %v560_v16 }
 0x189   : > { %1099 = vpush %v564_v17 }
 0x1ba   : > { %s1100_s17 = spop %1099 }
 0x1bb   : > { %v566_v26 = vstv %s1100_s17 }
 0x1bc   : > { %v567_v27 = vmul.f32 %v566_v26, %v549_v23  ;;  %v568_v28 = vmul.f32 %v566_v26, %v550_v24  ;;  %v569_v29 = vmul.f32 %v566_v26, %v551_v25  ;;  %v570_v38 = vmul.f32 %v566_v26, %v552_v31  ;;  %v826_v23 = vld [vmem:[%s1623_s7 + $0x10] sm:$0xff]  ;;  %v827_v24 = vld [vmem:[%s1623_s7 + $0x18] sm:$0xff] }
 0x1bd   : > { %v924_v25 = vld [vmem:[%s1625_s9 + $0x10] sm:$0xff]  ;;  %v925_v26 = vld [vmem:[%s1625_s9 + $0x18] sm:$0xff] }
 0x1be   : > { %v597_v32 = vmul.f32 %v588_v2, %v569_v29  ;;  %v596_v34 = vmul.f32 %v583_v19, %v568_v28  ;;  %v595_v36 = vmul.f32 %v578_v18, %v567_v27  ;;  %v598_v35 = vmul.f32 %v593_v30, %v570_v38  ;;  %v952_v2 = vld [vmem:[%s1626_s10 + $0x10] sm:$0xff]  ;;  %v953_v27 = vld [vmem:[%s1626_s10 + $0x18] sm:$0xff]  ;;  %v922_v29 = vld [vmem:[%s1625_s9] sm:$0xff] }
 0x1bf   : > { %v951_v30 = vld [vmem:[%s1626_s10 + $0x8] sm:$0xff] }
 0x1c0   : > { %v625_v39 = vadd.f32 %v616_v37, %v597_v32  ;;  %v624_v33 = vadd.f32 %v611_v21, %v596_v34  ;;  %v623_v40 = vadd.f32 %v606_v20, %v595_v36  ;;  %v626_v42 = vadd.f32 %v621_v41, %v598_v35  ;;  %v982_v32 = vld [vmem:[%s1628_s12] sm:$0xf] }
 0x1c2   : > { %643 = vrot.lane.b32.xlu2 %v624_v33, %s1239_s27  ;;  %641 = vrot.lane.b32.xlu1 %v623_v40, %s1239_s27 }
 0x1c3   : > { %645 = vrot.lane.b32.xlu0 %v625_v39, %s1239_s27 }
 0x1ca   : > { %687 = vperm.xlu2 %1164, %v665_v10   ;;  %647 = vrot.lane.b32.xlu1 %v626_v42, %s1239_s27 }
 0x1cb   : > { %682 = vperm.xlu0 %1166, %v1446_v4  }
 0x1d2   : > { %835 = vperm.xlu2 %1164, %v825_v43   ;;  %830 = vperm.xlu1 %1165, %v824_v44  }
 0x21c   : > { %v644_v53 = vpop.permute.xlu2 %643 }
 0x21d   : > { %656 = vst.msk [vmem:[#allocation2 + $0x10] sm:$0xff] %vm653_vm11, %v644_v53 }
 0x21e   : > { %657 = vst.msk [vmem:[#allocation2 + $0x18] sm:$0xff] %vm627_vm9, %v644_v53 }
 0x224   : > { %v667_v56 = vld [vmem:[#allocation2 + $0x10] sm:$0xff]  ;;  %v688_v28 = vpop.permute.xlu2 %687 }
 0x225   : > { %v1485_v57 = vmul.f32 %v678_v55, %v667_v56  ;;  %v720_v58 = vmul.f32 %v708_v54, %v667_v56  ;;  %v697_v7 = vld [vmem:[#allocation2 + $0x18] sm:$0xff]  ;;  %v781_v9 = vmul.f32 %v769_v50, %v667_v56 }
 0x226   : > { %v721_v8 = vmul.f32 %v708_v54, %v697_v7  ;;  %v782_v15 = vmul.f32 %v769_v50, %v697_v7 }
 0x227   : > { %738 = vrot.lane.b32.xlu1 %v720_v58, %s1241_s23 }
 0x22c   : > { %v836_v31 = vpop.permute.xlu2 %835 }
 0x234   : > { %v642_v60 = vpop.permute.xlu1 %641 }
 0x235   : > { %654 = vst.msk [vmem:[#allocation2] sm:$0xff] %vm653_vm11, %v642_v60  ;;  %v646_v61 = vpop.permute.xlu0 %645 }
 0x236   : > { %655 = vst.msk [vmem:[#allocation2 + $0x8] sm:$0xff] %vm627_vm9, %v642_v60 }
 0x237   : > { %658 = vst.msk [vmem:[#allocation2 + $0x20] sm:$0xff] %vm653_vm11, %v646_v61 }
 0x238   : > { %659 = vst.msk [vmem:[#allocation2 + $0x28] sm:$0xff] %vm627_vm9, %v646_v61 }
 0x23c   : > { %v648_v62 = vpop.permute.xlu1 %647  ;;  %v694_v63 = vld [vmem:[#allocation2] sm:$0xff] }
 0x23d   : > { %660 = vst.msk [vmem:[#allocation2 + $0x30] sm:$0xff] %vm653_vm11, %v648_v62  ;;  %v695_v0 = vld [vmem:[#allocation2 + $0x8] sm:$0xff]  ;;  %v718_v1 = vmul.f32 %v704_v46, %v694_v63  ;;  %v1493_v3 = vmul.f32 %v694_v63, %v673_v51  ;;  %v779_v10 = vmul.f32 %v765_v47, %v694_v63  ;;  %v683_v38 = vpop.permute.xlu0 %682 }
 0x23e   : > { %661 = vst.msk [vmem:[#allocation2 + $0x38] sm:$0xff] %vm627_vm9, %v648_v62  ;;  %v1496_v4 = vld [vmem:[#allocation2 + $0x20] sm:$0xff]  ;;  %v719_v5 = vmul.f32 %v704_v46, %v695_v0  ;;  %v780_v17 = vmul.f32 %v765_v47, %v695_v0 }
 0x23f   : > { %734 = vrot.lane.b32.xlu2 %v718_v1, %s1241_s23  ;;  %v722_v6 = vmul.f32 %v712_v48, %v1496_v4  ;;  %v699_v11 = vld [vmem:[#allocation2 + $0x28] sm:$0xff]  ;;  %v783_v20 = vmul.f32 %v773_v59, %v1496_v4  ;;  %v692_v51 = vmul.f32 %v683_v38, %v1496_v4 }
 0x240   : > { %736 = vrot.lane.b32.xlu0 %v719_v5, %s1241_s23  ;;  %v723_v13 = vmul.f32 %v712_v48, %v699_v11  ;;  %v784_v18 = vmul.f32 %v773_v59, %v699_v11 }
 0x241   : > { %742 = vrot.lane.b32.xlu1 %v722_v6, %s1241_s23  ;;  %v857_v6 = vstv %s856_s18 }
 0x244   : > { %v1503_v12 = vld [vmem:[#allocation2 + $0x30] sm:$0xff]  ;;  %v831_v36 = vpop.permute.xlu1 %830 }
 0x245   : > { %v724_v14 = vmul.f32 %v716_v49, %v1503_v12  ;;  %v701_v16 = vld [vmem:[#allocation2 + $0x38] sm:$0xff]  ;;  %v785_v21 = vmul.f32 %v777_v52, %v1503_v12 }
 0x246   : > { %v725_v19 = vmul.f32 %v716_v49, %v701_v16  ;;  %v786_v22 = vmul.f32 %v777_v52, %v701_v16 }
 0x247   : > { %740 = vrot.lane.b32.xlu2 %v721_v8, %s1241_s23 }
 0x248   : > { %799 = vrot.lane.b32.xlu0 %v781_v9, %s1242_s25 }
 0x249   : > { %795 = vrot.lane.b32.xlu1 %v779_v10, %s1242_s25 }
 0x24f   : > { %744 = vrot.lane.b32.xlu2 %v723_v13, %s1241_s23 }
 0x250   : > { %746 = vrot.lane.b32.xlu0 %v724_v14, %s1241_s23 }
 0x251   : > { %801 = vrot.lane.b32.xlu1 %v782_v15, %s1242_s25 }
 0x257   : > { %797 = vrot.lane.b32.xlu2 %v780_v17, %s1242_s25 }
 0x258   : > { %805 = vrot.lane.b32.xlu0 %v784_v18, %s1242_s25 }
 0x259   : > { %748 = vrot.lane.b32.xlu1 %v725_v19, %s1241_s23 }
 0x25f   : > { %803 = vrot.lane.b32.xlu2 %v783_v20, %s1242_s25 }
 0x260   : > { %807 = vrot.lane.b32.xlu0 %v785_v21, %s1242_s25 }
 0x261   : > { %809 = vrot.lane.b32.xlu1 %v786_v22, %s1242_s25 }
 0x267   : > { %840 = vperm.xlu2 %1164, %v826_v23  }
 0x268   : > { %845 = vperm.xlu0 %1166, %v827_v24  }
 0x270   : > { %938 = vperm.xlu0 %1166, %v924_v25  }
 0x278   : > { %943 = vperm.xlu0 %1166, %v925_v26  }
 0x280   : > { %966 = vperm.xlu0 %1166, %v952_v2  }
 0x288   : > { %971 = vperm.xlu0 %1166, %v953_v27  }
 0x290   : > { %928 = vperm.xlu0 %1166, %v922_v29  }
 0x298   : > { %961 = vperm.xlu0 %1166, %v951_v30   ;;  %v950_v30 = vld [vmem:[%s1626_s10] sm:$0xff] }
 0x299   : > { %v735_v34 = vpop.permute.xlu2 %734  ;;  %v739_v39 = vpop.permute.xlu1 %738 }
 0x2a0   : > { %985 = vperm.xlu0 %1166, %v982_v32  }
 0x2a1   : > { %v741_v37 = vpop.permute.xlu2 %740 }
 0x2a2   : > { %v752_v46 = vsel %vm750_vm12, %v739_v39, %v741_v37 }
 0x2a3   : > { %v760_v52 = vadd.f32 %v752_v46, %v1485_v57 }
 0x2a9   : > { %v745_v33 = vpop.permute.xlu2 %744 }
 0x2b1   : > { %v798_v43 = vpop.permute.xlu2 %797 }
 0x2b2   : > { %v737_v40 = vpop.permute.xlu0 %736 }
 0x2b3   : > { %v743_v35 = vpop.permute.xlu1 %742  ;;  %v751_v48 = vsel %vm750_vm12, %v735_v34, %v737_v40 }
 0x2b4   : > { %v753_v49 = vsel %vm750_vm12, %v743_v35, %v745_v33  ;;  %v759_v55 = vadd.f32 %v751_v48, %v1493_v3  ;;  %v693_v3 = vmul.f32 %v1503_v12, %v688_v28 }
 0x2b5   : > { %v761_v56 = vadd.f32 %v753_v49, %v692_v51 }
 0x2b9   : > { %v804_v47 = vpop.permute.xlu2 %803 }
 0x2ba   : > { %v800_v41 = vpop.permute.xlu0 %799 }
 0x2bb   : > { %v796_v42 = vpop.permute.xlu1 %795 }
 0x2bc   : > { %v812_v53 = vsel %vm811_vm13, %v796_v42, %v798_v43 }
 0x2bd   : > { %v820_v61 = vadd.f32 %v812_v53, %v759_v55 }
 0x2bf   : > { %v848_v1 = vadd.f32 %v831_v36, %v820_v61 }
 0x2c1   : > { %v841_v0 = vpop.permute.xlu2 %840  ;;  %v858_v9 = vmul.f32 %v857_v6, %v848_v1  ;;  %vm852_vm15 = vcmp.gt.f32.partialorder %v848_v1, 0.0 }
 0x2c2   : > { %v747_v44 = vpop.permute.xlu0 %746 }
 0x2c3   : > { %v802_v45 = vpop.permute.xlu1 %801  ;;  %v1552_v16 = vsel %vm852_vm15, %v848_v1, %v858_v9 }
 0x2c4   : > { %v813_v50 = vsel %vm811_vm13, %v800_v41, %v802_v45  ;;  %v878_v21 = vmul.f32 %v1552_v16, %v1552_v16 }
 0x2c5   : > { %v821_v58 = vadd.f32 %v813_v50, %v760_v52 }
 0x2c7   : > { %v849_v63 = vadd.f32 %v836_v31, %v821_v58  ;;  %v923_v31 = vld [vmem:[%s1625_s9 + $0x8] sm:$0xff] }
 0x2c9   : > { %v859_v7 = vmul.f32 %v857_v6, %v849_v63  ;;  %vm853_vm14 = vcmp.gt.f32.partialorder %v849_v63, 0.0 }
 0x2ca   : > { %v806_v54 = vpop.permute.xlu0 %805 }
 0x2cb   : > { %v814_v59 = vsel %vm811_vm13, %v804_v47, %v806_v54  ;;  %v749_v60 = vpop.permute.xlu1 %748  ;;  %v1550_v14 = vsel %vm853_vm14, %v849_v63, %v859_v7 }
 0x2cc   : > { %v822_v62 = vadd.f32 %v814_v59, %v761_v56  ;;  %v754_v8 = vsel %vm750_vm12, %v747_v44, %v749_v60  ;;  %v879_v19 = vmul.f32 %v1550_v14, %v1550_v14  ;;  %v866_v12 = vadd.f32 %v1550_v14, %v1552_v16 }
 0x2cd   : > { %v762_v13 = vadd.f32 %v754_v8, %v693_v3 }
 0x2ce   : > { %v850_v5 = vadd.f32 %v841_v0, %v822_v62  ;;  %v882_v25 = vadd.f32 %v879_v19, %v878_v21  ;;  %v978_v19 = vld [vmem:[%s1627_s11] sm:$0xf] }
 0x2d0   : > { %v860_v10 = vmul.f32 %v857_v6, %v850_v5  ;;  %vm854_vm0 = vcmp.gt.f32.partialorder %v850_v5, 0.0 }
 0x2d2   : > { %v808_v4 = vpop.permute.xlu0 %807  ;;  %v1554_v17 = vsel %vm854_vm0, %v850_v5, %v860_v10 }
 0x2d3   : > { %v810_v57 = vpop.permute.xlu1 %809  ;;  %v880_v22 = vmul.f32 %v1554_v17, %v1554_v17  ;;  %v867_v24 = vadd.f32 %v866_v12, %v1554_v17  ;;  %v979_v12 = vpack.c.bf16 %v978_v19, %v978_v19 }
 0x2d4   : > { %v815_v11 = vsel %vm811_vm13, %v808_v4, %v810_v57 }
 0x2d5   : > { %v823_v15 = vadd.f32 %v815_v11, %v762_v13  ;;  %v883_v28 = vadd.f32 %v882_v25, %v880_v22 }
 0x2da   : > { %v846_v18 = vpop.permute.xlu0 %845 }
 0x2db   : > { %v851_v20 = vadd.f32 %v846_v18, %v823_v15 }
 0x2dd   : > { %vm855_vm1 = vcmp.gt.f32.partialorder %v851_v20, 0.0  ;;  %v861_v23 = vmul.f32 %v857_v6, %v851_v20 }
 0x2df   : > { %v1565_v26 = vsel %vm855_vm1, %v851_v20, %v861_v23 }
 0x2e0   : > { %v868_v2 = vadd.f32 %v867_v24, %v1565_v26  ;;  %v881_v27 = vmul.f32 %v1565_v26, %v1565_v26 }
 0x2e2   : > { %869 = vadd.xlane.f32.xlu1 %v868_v2  ;;  %v884_v29 = vadd.f32 %v883_v28, %v881_v27  ;;  %v939_v54 = vpop.permute.xlu0 %938 }
 0x2e4   : > { %885 = vadd.xlane.f32.xlu2 %v884_v29 }
 0x2ea   : > { %v944_v55 = vpop.permute.xlu0 %943 }
 0x2f2   : > { %v967_v56 = vpop.permute.xlu0 %966 }
 0x2fa   : > { %v972_v58 = vpop.permute.xlu0 %971 }
 0x2fb   : > { %956 = vperm.xlu1 %1165, %v950_v30  }
 0x2fc   : > { %933 = vperm.xlu2 %1164, %v923_v31  }
 0x302   : > { %v929_v59 = vpop.permute.xlu0 %928 }
 0x355   : > { %v870_v32 = vpop.xlane.xlu1 %869 }
 0x356   : > { %v871_v34 = vrot.slane %v870_v32, 4 }
 0x357   : > { %v886_v36 = vpop.xlane.xlu2 %885 }
 0x358   : > { %v872_v37 = vadd.f32 %v871_v34, %v870_v32  ;;  %v887_v38 = vrot.slane %v886_v36, 4 }
 0x35a   : > { %v873_v39 = vrot.slane %v872_v37, 2  ;;  %v888_v33 = vadd.f32 %v887_v38, %v886_v36 }
 0x35c   : > { %v889_v40 = vrot.slane %v888_v33, 2  ;;  %v874_v35 = vadd.f32 %v873_v39, %v872_v37 }
 0x35e   : > { %v875_v41 = vrot.slane %v874_v35, 1  ;;  %v890_v42 = vadd.f32 %v889_v40, %v888_v33 }
 0x35f   : > { %v934_v7 = vpop.permute.xlu2 %933 }
 0x360   : > { %v876_v43 = vadd.f32 %v875_v41, %v874_v35  ;;  %v891_v44 = vrot.slane %v890_v42, 1 }
 0x362   : > { %1101 = vpush %v876_v43  ;;  %v892_v45 = vadd.f32 %v891_v44, %v890_v42 }
 0x364   : > { %1103 = vpush %v892_v45 }
 0x36d   : > { %v957_v15 = vpop.permute.xlu1 %956 }
 0x393   : > { %s1102_s28 = spop %1101 }
 0x394   : > { %s894_s8 = smul.f32 0.00024414063, %s1102_s28  ;;  %s1091_s28 = sshll.u32 %s1340_s3, 2 }
 0x395   : > { %s1104_s17 = spop %1103 }
 0x396   : > { %s896_s27 = smul.f32 %s894_s8, %s894_s8  ;;  %v899_v60 = vstv %s894_s8  ;;  %s1085_s8 = sshll.u32 %s431_s26, 2 }
 0x397   : > { %s895_s14 = smul.f32 0.00024414063, %s1104_s17  ;;  %v900_v61 = vsub.f32 %v1552_v16, %v899_v60  ;;  %v901_v62 = vsub.f32 %v1550_v14, %v899_v60  ;;  %v902_v63 = vsub.f32 %v1554_v17, %v899_v60  ;;  %v903_v0 = vsub.f32 %v1565_v26, %v899_v60  ;;  %v962_v14 = vpop.permute.xlu0 %961 }
 0x399   : > { %s897_s19 = ssub.f32 %s895_s14, %s896_s27  ;;  %s1017_s14 = scalar_lea.hbm %s1629_s13, %s1091_s28 }
 0x39a   : > { %s1191_s28 = scalar_lea.hbm %s1629_s13, 8 }
 0x39b   : > { %s898_s18 = smax.f32 %s1237_s24, %s897_s19  ;;  %s433_s19 = scalar_lea.vmem [#allocation5], %s1085_s8 }
 0x39c   : > { %s904_s22 = sadd.f32 1e-08, %s898_s18  ;;  %s1019_s18 = sshll.u32 %s433_s19, 4  ;;  %s1020_s18 = int_to_ptr.vmem [resolvable:$true] %s1019_s18 }
 0x39e   : > { %v905_v46 = vstv %s904_s22  ;;  %s1021_s22 = sshll.u32 %s1017_s14, 4  ;;  %s1022_s22 = int_to_ptr.hbm [resolvable:$true] %s1021_s22 }
 0x39f   : > { %1169 = vrsqrt.f32 %v905_v46  ;;  %vm912_vm3 = vweird.f32 %v905_v46  ;;  %v986_v21 = vpop.permute.xlu0 %985  ;;  %s1185_s23 = sshra.s32 %s1022_s22, 4  ;;  %s1186_s23 = int_to_ptr.hbm [resolvable:$true] %s1185_s23 }
 0x3a0   : > { %s1187_s25 = scalar_lea.hbm %s1186_s23, 4  ;;  %p1192_p0 = scmp.lt.s32.totalorder %s1186_s23, %s1629_s13 }
 0x3a1   : > { %p1188_p11 = scmp.ne.s32.totalorder %s1186_s23, %s1187_s25  ;;  %p1193_p1 = scmp.lt.s32.totalorder %s1191_s28, %s1187_s25 }
 0x3a3   : > { %p1189_p12 = pnand %p1188_p11, %p1357_p5  ;;  %p1194_p2 = por %p1193_p1, %p1192_p0 }
 0x3a5   : > { %v1170_v47 = vpop.eup %1169  ;;  %p1190_p13 = pneg %p1189_p12 }
 0x3a6   : > { %v907_v48 = vmul.f32 %v1170_v47, %v905_v46  ;;  %vm913_vm2 = vweird.f32 %v1170_v47 }
 0x3a7   : > { %vm914_vm4 = vmor %vm912_vm3, %vm913_vm2  ;;  %p1195_p3 = pnand %p1194_p2, %p1190_p13 }
 0x3a8   : > { %v908_v49 = vmul.f32 %v1170_v47, %v907_v48 }
 0x3aa   : > { %v909_v50 = vmul.f32 0.5, %v908_v49 }
 0x3ac   : > { %v910_v51 = vsub.f32 1.5, %v909_v50 }
 0x3ae   : > { %v911_v52 = vmul.f32 %v1170_v47, %v910_v51 }
 0x3b0   : > { %v915_v53 = vsel %vm914_vm4, %v1170_v47, %v911_v52 }
 0x3b1   : > { %1105 = vpush %v915_v53 }
 0x3e2   : > { %s1106_s24 = spop %1105 }
 0x3e3   : > { %v917_v1 = vstv %s1106_s24  ;;  %s1007_s24 = scalar_lea.sflag [#allocation6], %s431_s26 }
 0x3e4   : > { %v918_v5 = vmul.f32 %v917_v1, %v900_v61  ;;  %v919_v4 = vmul.f32 %v917_v1, %v901_v62  ;;  %v920_v6 = vmul.f32 %v917_v1, %v902_v63  ;;  %v921_v57 = vmul.f32 %v917_v1, %v903_v0 }
 0x3e6   : > { %v948_v8 = vmul.f32 %v939_v54, %v920_v6  ;;  %v949_v3 = vmul.f32 %v944_v55, %v921_v57  ;;  %v946_v9 = vmul.f32 %v929_v59, %v918_v5  ;;  %v947_v10 = vmul.f32 %v934_v7, %v919_v4 }
 0x3e8   : > { %v976_v11 = vadd.f32 %v967_v56, %v948_v8  ;;  %v977_v13 = vadd.f32 %v972_v58, %v949_v3  ;;  %v974_v17 = vadd.f32 %v957_v15, %v946_v9  ;;  %v975_v18 = vadd.f32 %v962_v14, %v947_v10 }
 0x3ea   : > { %v981_v16 = vpack.c.bf16 %v977_v13, %v976_v11  ;;  %v980_v20 = vpack.c.bf16 %v975_v18, %v974_v17 }
 0x3ec   : > { %998 = vmatpush.bf16.msra.mxu1 %v981_v16 }
 0x3f0   : > { %999 = vmatpush.bf16.msra.mxu1 %v980_v20 }
 0x3f3   : > { %1089 = vmatmul.msk.bf16.vlgmr.msra.gmra.mxu1 %vm988_vm5, %v979_v12 }
 0x470   : > { %v1001_v22 = vpop.f32.mrf.mxu1 }
 0x471   : > { %v1002_v23 = vadd.f32 %v1001_v22, %v986_v21 }
 0x473   : > { %1005 = vst [vmem:[%s433_s19] sm:$0xf] %v1002_v23 }
 0x474   : > { %1198 = shalt.err (!%p1195_p3)
}
 0x475   : > { %1107 = dma.vmem_to_hbm [thread:$0]  (%p1357_p5), %s1020_s18, 64, %s1022_s22, %s1007_s24  }
 0x478   : > { %v1003_v24 = vpop.f32.mrf.mxu1 }
 0x479 PF: > { %p1113_p4 = scmp.ge.s32.totalorder %s1233_s15, 2  ;;  %s1033_s26 = sand.u32 1, %s1221_s29  }
 0x47a   : > { %s1034_s14 = scalar_lea.sflag [#allocation6], %s1033_s26 }
 0x47b   : > { %p1110_p7 = pnand %p1113_p4, %p1361_p6 }
 0x47d   : > { %p1111_p8 = pneg %p1110_p7 }
 0x47f   : > { %1216 = dma.done.wait (%p1111_p8), %s1034_s14, 64  }
 0x480   : > { %1218 = vsyncadd (%p1111_p8), %s1034_s14, 4294967232  ;;  %s1635_s19 = sld [smem:[#allocation8_spill]]  ;;  %p25_p9 = scmp.ge.s32.totalorder %s1344_s16, 4  }
 0x481   : > { %s1636_s14 = sld [smem:[#allocation9_spill]]  ;;  %s1637_s29 = smov %s1225_s30 }
 0x482   : > { %s1639_s15 = smov %s1344_s16  ;;  %27 = sbr.rel (!%p25_p9) target bundleno = 6 (0x6), region = 107 }
 0x486   : > { %s1638_s30 = smov %s1635_s19 }
 0x487   :  { %1040 = vsyncpa [#allocation6], 1 }
 0x488   :  { %1042 = vsyncpa [#allocation6 + $0x1], 1 }

</bundles_post_ra>
